<compile_context>
chip_gen: v6e
topology: v6e:2x2x1
jax: 0.10.0
libtpu: 0.0.40
codegen_flags: <defaults>
</compile_context>

<pallas_src>
from functools import partial

import numpy as np
import jax
import jax.numpy as jnp
from jax.experimental import pallas as pl
from jax.experimental.pallas import tpu as pltpu

# ----- module hyper-parameters (args.*) -----
PROTEIN_RADIUS = 15.0     # args.protein_radius (GaussianSmearing stop)
LIG_RADIUS = 5.0          # args.lig_radius (radius-graph cutoff)
RADIUS_EMB_DIM = 32       # args.radius_emb_dim
FOLD_DIM = 32             # args.fold_dim
TILE_E = 8192             # max edge tile on the LANE axis (~1 MiB/operand/block)
VMEM_LIMIT_BYTES = 32 * 1024 * 1024   # explicit scoped-VMEM limit (>= v5e's 16 MiB default)


def _use_bf16_smearing():
    """bf16 EUP/VPU path for the Gaussian-smearing exp chain: v6e / v7x only."""
    kind = jax.devices()[0].device_kind.lower()
    return ("v6" in kind) or ("v7" in kind)


def make_lig_radius_embedder_kernel(coeff, bf16_smearing):
    """out = edge_attr + W2^T @ relu(W1^T @ GaussianSmearing(dist) + b1) + b2
    Feature-major: features on sublanes, edges on lanes (lane-dense loads/stores)."""
    def kernel(dist_ref, ea_ref, off_ref, w1t_ref, b1_ref, w2t_ref, b2_ref, out_ref):
        d = dist_ref[...]                                  # (1, T)  f32
        off = off_ref[...]                                 # (R, 1)  f32
        diff = d - off                                     # (R, T)  f32
        arg = coeff * diff * diff                          # (R, T)  f32
        if bf16_smearing:
            # v6e/v7x: bf16 EUP exp (half the element count), result feeds the
            # MXU directly with no extra cast.
            rbf = jnp.exp(arg.astype(jnp.bfloat16))
        else:
            # v5e and older: no bf16 VPU/EUP -> keep exp in f32, cast only at
            # the MXU operand boundary.
            rbf = jnp.exp(arg).astype(jnp.bfloat16)
        # Linear 1 + ReLU (weights pre-cast to bf16 on host; f32 accumulation)
        h = jnp.dot(w1t_ref[...], rbf, preferred_element_type=jnp.float32) + b1_ref[...]
        h = jnp.maximum(h, 0.0).astype(jnp.bfloat16)       # (F, T)
        # Linear 2
        emb = jnp.dot(w2t_ref[...], h, preferred_element_type=jnp.float32) + b2_ref[...]
        out_ref[...] = ea_ref[...] + emb
    return kernel


def lig_radius_embed_add(dist_row, edge_attr_t, offsets_col, w1t, b1, w2t, b2,
                         coeff, bf16_smearing, tile):
    """dist_row: (1, E_pad) f32, edge_attr_t: (F, E_pad) f32 (feature-major).
    Returns edge_attr_t + embedder(dist) as (F, E_pad) f32."""
    F_dim, E_pad = edge_attr_t.shape
    R = offsets_col.shape[0]
    assert E_pad % tile == 0 and tile % 128 == 0
    grid = (E_pad // tile,)
    return pl.pallas_call(
        make_lig_radius_embedder_kernel(coeff, bf16_smearing),
        out_shape=jax.ShapeDtypeStruct((F_dim, E_pad), jnp.float32),
        grid_spec=pltpu.PrefetchScalarGridSpec(
            num_scalar_prefetch=0,
            grid=grid,
            in_specs=[
                pl.BlockSpec((1, tile), lambda i: (0, i)),        # dist      (1, E)
                pl.BlockSpec((F_dim, tile), lambda i: (0, i)),    # edge_attr (F, E)
                pl.BlockSpec((R, 1), lambda i: (0, 0)),           # gaussian offsets (R, 1)
                pl.BlockSpec((F_dim, R), lambda i: (0, 0)),       # W1^T (bf16)
                pl.BlockSpec((F_dim, 1), lambda i: (0, 0)),       # b1
                pl.BlockSpec((F_dim, F_dim), lambda i: (0, 0)),   # W2^T (bf16)
                pl.BlockSpec((F_dim, 1), lambda i: (0, 0)),       # b2
            ],
            out_specs=pl.BlockSpec((F_dim, tile), lambda i: (0, i)),
        ),
        compiler_params=pltpu.CompilerParams(
            dimension_semantics=("parallel",),         # >= 2 steps -> 2-TC split on v7x
            vmem_limit_bytes=VMEM_LIMIT_BYTES),
    )(dist_row, edge_attr_t, offsets_col, w1t, b1, w2t, b2)


@partial(jax.jit, static_argnames=("coeff", "bf16_smearing", "tile"))
def lig_edge_embed_forward(pos, src, dst, edge_attr_t, offsets_col, w1t, b1, w2t, b2,
                           *, coeff, bf16_smearing, tile):
    """Device side of LigEdgeBuilder.forward after the (dynamic) radius graph:
    edge_vec / dist computed on device, then the Pallas embedder kernel.
    edge_attr_t is FEATURE-MAJOR (F, E_pad); output is feature-major too."""
    edge_vec = pos[dst] - pos[src]                                       # (E_pad, 3)
    dist_row = jnp.sqrt(jnp.sum(edge_vec * edge_vec, axis=-1))[None, :]  # (1, E_pad)
    return lig_radius_embed_add(dist_row, edge_attr_t, offsets_col, w1t, b1, w2t, b2,
                                coeff, bf16_smearing, tile)


def build_cg_general_host(pos, edge_attr, edge_index, batch, radius):
    """Replicates build_cg_general (torch_cluster.radius semantics: all same-batch
    pairs within `radius`, x == y so self-matches kept).  Pairwise distances are
    computed with jnp on device; the dynamic-count edge extraction is host glue."""
    # TODO(synk): torch_cluster.radius yields a dynamic-shape edge set; nonzero kept host-side.
    pos_d = jnp.asarray(pos)
    d2 = np.asarray(jnp.sum((pos_d[:, None, :] - pos_d[None, :, :]) ** 2, axis=-1))
    same_batch = batch[:, None] == batch[None, :]
    yi, xi = np.nonzero((d2 <= radius * radius) & same_batch)
    radius_edge_idx = np.stack([yi, xi], axis=0).astype(np.int64)
    ei = np.concatenate([edge_index.astype(np.int64), radius_edge_idx], axis=1)
    pad = np.zeros((radius_edge_idx.shape[1], edge_attr.shape[1]), edge_attr.dtype)
    ea = np.concatenate([edge_attr, pad], axis=0)
    return ei, ea


def _choose_tiling(e):
    """Pad the edge count so the lane axis tiles evenly AND the grid has at
    least 2 steps (megacore split on v7x); tile stays a multiple of 128."""
    e_pad = max(256, ((e + 255) // 256) * 256)
    if e_pad // 2 <= TILE_E:
        tile = e_pad // 2
    else:
        step = 2 * TILE_E
        e_pad = ((e_pad + step - 1) // step) * step
        tile = TILE_E
    return e_pad, tile


if __name__ == "__main__":
    key = jax.random.PRNGKey(0)
    k_pos, k_ea, k_w1, k_b1, k_w2, k_b2 = jax.random.split(key, 6)

    # ----- synthetic ligand data (small shapes) -----
    N = 16          # ligand atoms
    E_bond = 20     # bond edges
    pos = np.asarray(jax.random.normal(k_pos, (N, 3), dtype=jnp.float32)) * 3.0
    batch = np.zeros(N, dtype=np.int64)
    batch[N // 2:] = 1
    rng = np.random.RandomState(0)
    bond_edge_index = np.stack(
        [rng.randint(0, N, E_bond), rng.randint(0, N, E_bond)], axis=0)
    lig_ea = np.asarray(jax.random.normal(k_ea, (E_bond, FOLD_DIM), dtype=jnp.float32))

    # ----- deterministic parameter init (lig_radius_embedder) -----
    offsets_1d = np.linspace(0.0, PROTEIN_RADIUS, RADIUS_EMB_DIM).astype(np.float32)
    coeff = float(-0.5 / (offsets_1d[1] - offsets_1d[0]) ** 2)
    w1 = np.asarray(jax.random.normal(k_w1, (RADIUS_EMB_DIM, FOLD_DIM), dtype=jnp.float32)
                    * (1.0 / np.sqrt(RADIUS_EMB_DIM)))
    b1 = np.asarray(jax.random.normal(k_b1, (1, FOLD_DIM), dtype=jnp.float32) * 0.01)
    w2 = np.asarray(jax.random.normal(k_w2, (FOLD_DIM, FOLD_DIM), dtype=jnp.float32)
                    * (1.0 / np.sqrt(FOLD_DIM)))
    b2 = np.asarray(jax.random.normal(k_b2, (1, FOLD_DIM), dtype=jnp.float32) * 0.01)

    # feature-major (lane-dense) device-side parameters; weights pre-cast to bf16
    offsets_col = jnp.asarray(offsets_1d.reshape(-1, 1))                         # (R, 1) f32
    w1t = jnp.asarray(np.ascontiguousarray(w1.T), dtype=jnp.bfloat16)            # (F, R) bf16
    w2t = jnp.asarray(np.ascontiguousarray(w2.T), dtype=jnp.bfloat16)            # (F, F) bf16
    b1c = jnp.asarray(b1.reshape(FOLD_DIM, 1))                                   # (F, 1) f32
    b2c = jnp.asarray(b2.reshape(FOLD_DIM, 1))                                   # (F, 1) f32

    bf16_smearing = _use_bf16_smearing()

    # ----- forward: radius graph (host glue), then fused device path -----
    edge_index, edge_attr = build_cg_general_host(
        pos, lig_ea, bond_edge_index, batch, LIG_RADIUS)
    E = edge_index.shape[1]
    E_pad, tile = _choose_tiling(E)
    src_p = np.zeros(E_pad, np.int32); src_p[:E] = edge_index[0]
    dst_p = np.zeros(E_pad, np.int32); dst_p[:E] = edge_index[1]
    # edge_attr kept FEATURE-MAJOR end-to-end (built that way on host; no device transpose)
    ea_t_p = np.zeros((FOLD_DIM, E_pad), np.float32); ea_t_p[:, :E] = edge_attr.T

    out_t_pad = lig_edge_embed_forward(
        jnp.asarray(pos), jnp.asarray(src_p), jnp.asarray(dst_p), jnp.asarray(ea_t_p),
        offsets_col, w1t, b1c, w2t, b2c,
        coeff=coeff, bf16_smearing=bf16_smearing, tile=tile)
    out_t_pad = np.asarray(jax.block_until_ready(out_t_pad))
    # NOTE: padded tail columns are NOT zero (dist=0 -> nonzero embedding); any
    # in-jit consumer must mask them.  Here we just drop them host-side.
    out = out_t_pad[:, :E].T                                   # (E, F) edge-major view

    # ----- reference check (plain numpy, f32 weights) -----
    src, dst = edge_index
    edge_vec = pos[dst] - pos[src]
    dist = np.linalg.norm(edge_vec, axis=-1).astype(np.float32)
    rbf = np.exp(coeff * (dist[:, None] - offsets_1d[None, :]) ** 2)
    h = np.maximum(rbf @ w1 + b1, 0.0)
    ref = edge_attr + h @ w2 + b2
    # bf16 MXU operands / bf16 exp (f32 accumulation) -> looser tolerance than pure-f32
    assert np.allclose(out, ref, atol=5e-2, rtol=5e-2), (
        f"mismatch vs reference: max abs err {np.max(np.abs(out - ref))}")

    print("KERNEL_OK")
</pallas_src>

<mosaic_0001>
module attributes {stable_mosaic.version = 11 : i64} {
  func.func @kernel(%arg0: i32, %arg1: memref<1x128xf32, #tpu.memory_space<vmem>>, %arg2: memref<32x128xf32, #tpu.memory_space<vmem>>, %arg3: memref<32x1xf32, #tpu.memory_space<vmem>>, %arg4: memref<32x32xbf16, #tpu.memory_space<vmem>>, %arg5: memref<32x1xf32, #tpu.memory_space<vmem>>, %arg6: memref<32x32xbf16, #tpu.memory_space<vmem>>, %arg7: memref<32x1xf32, #tpu.memory_space<vmem>>, %arg8: memref<32x128xf32, #tpu.memory_space<vmem>>) attributes {dimension_semantics = [#tpu.dimension_semantics<parallel>], iteration_bounds = array<i64: 2>, scalar_prefetch = 0 : i64, scratch_operands = 0 : i64, tpu.core_type = #tpu.core_type<tc>, window_params = [{transform_indices = @transform_0, window_bounds = array<i64: 1, 128>}, {transform_indices = @transform_1, window_bounds = array<i64: 32, 128>}, {pipeline_mode = #tpu.pipeline_mode<synchronous>, transform_indices = @transform_2, window_bounds = array<i64: 32, 1>}, {pipeline_mode = #tpu.pipeline_mode<synchronous>, transform_indices = @transform_3, window_bounds = array<i64: 32, 32>}, {pipeline_mode = #tpu.pipeline_mode<synchronous>, transform_indices = @transform_4, window_bounds = array<i64: 32, 1>}, {pipeline_mode = #tpu.pipeline_mode<synchronous>, transform_indices = @transform_5, window_bounds = array<i64: 32, 32>}, {pipeline_mode = #tpu.pipeline_mode<synchronous>, transform_indices = @transform_6, window_bounds = array<i64: 32, 1>}, {transform_indices = @transform_7, window_bounds = array<i64: 32, 128>}]} {
    %c0 = arith.constant 0 : index
    %c0_0 = arith.constant 0 : index
    %0 = vector.load %arg1[%c0, %c0_0] : memref<1x128xf32, #tpu.memory_space<vmem>>, vector<1x128xf32>
    %c0_1 = arith.constant 0 : index
    %c0_2 = arith.constant 0 : index
    %1 = vector.load %arg3[%c0_1, %c0_2] : memref<32x1xf32, #tpu.memory_space<vmem>>, vector<32x1xf32>
    %2 = vector.broadcast %0 : vector<1x128xf32> to vector<32x128xf32>
    %3 = vector.broadcast %1 : vector<32x1xf32> to vector<32x128xf32>
    %4 = arith.subf %2, %3 : vector<32x128xf32>
    %cst = arith.constant -2.13555574 : f32
    %5 = vector.broadcast %cst : f32 to vector<32x128xf32>
    %6 = arith.mulf %5, %4 : vector<32x128xf32>
    %7 = arith.mulf %6, %4 : vector<32x128xf32>
    %8 = math.exp %7 : vector<32x128xf32>
    %9 = arith.truncf %8 : vector<32x128xf32> to vector<32x128xbf16>
    %c0_3 = arith.constant 0 : index
    %c0_4 = arith.constant 0 : index
    %10 = vector.load %arg4[%c0_3, %c0_4] : memref<32x32xbf16, #tpu.memory_space<vmem>>, vector<32x32xbf16>
    %cst_5 = arith.constant dense<0.000000e+00> : vector<32x128xf32>
    %11 = tpu.matmul %10, %9, %cst_5 {dimension_numbers = #tpu.dot_dimension_numbers<[1], [0], [0], [1], [0, 0, 1, 1], [], []>} : vector<32x32xbf16>, vector<32x128xbf16>, vector<32x128xf32> -> vector<32x128xf32>
    %c0_6 = arith.constant 0 : index
    %c0_7 = arith.constant 0 : index
    %12 = vector.load %arg5[%c0_6, %c0_7] : memref<32x1xf32, #tpu.memory_space<vmem>>, vector<32x1xf32>
    %13 = vector.broadcast %12 : vector<32x1xf32> to vector<32x128xf32>
    %14 = arith.addf %11, %13 : vector<32x128xf32>
    %cst_8 = arith.constant 0.000000e+00 : f32
    %15 = vector.broadcast %cst_8 : f32 to vector<32x128xf32>
    %16 = arith.maximumf %14, %15 : vector<32x128xf32>
    %17 = arith.truncf %16 : vector<32x128xf32> to vector<32x128xbf16>
    %c0_9 = arith.constant 0 : index
    %c0_10 = arith.constant 0 : index
    %18 = vector.load %arg6[%c0_9, %c0_10] : memref<32x32xbf16, #tpu.memory_space<vmem>>, vector<32x32xbf16>
    %cst_11 = arith.constant dense<0.000000e+00> : vector<32x128xf32>
    %19 = tpu.matmul %18, %17, %cst_11 {dimension_numbers = #tpu.dot_dimension_numbers<[1], [0], [0], [1], [0, 0, 1, 1], [], []>} : vector<32x32xbf16>, vector<32x128xbf16>, vector<32x128xf32> -> vector<32x128xf32>
    %c0_12 = arith.constant 0 : index
    %c0_13 = arith.constant 0 : index
    %20 = vector.load %arg7[%c0_12, %c0_13] : memref<32x1xf32, #tpu.memory_space<vmem>>, vector<32x1xf32>
    %21 = vector.broadcast %20 : vector<32x1xf32> to vector<32x128xf32>
    %22 = arith.addf %19, %21 : vector<32x128xf32>
    %c0_14 = arith.constant 0 : index
    %c0_15 = arith.constant 0 : index
    %23 = vector.load %arg2[%c0_14, %c0_15] : memref<32x128xf32, #tpu.memory_space<vmem>>, vector<32x128xf32>
    %24 = arith.addf %23, %22 : vector<32x128xf32>
    %c0_16 = arith.constant 0 : index
    %c0_17 = arith.constant 0 : index
    %25 = vector.load %arg8[%c0_16, %c0_17] : memref<32x128xf32, #tpu.memory_space<vmem>>, vector<32x128xf32>
    tpu.vector_store %arg8[%c0_16, %c0_17], %24 {strides = array<i32>} : memref<32x128xf32, #tpu.memory_space<vmem>>, vector<32x128xf32>,
    return
  }
  func.func @transform_0(%arg0: i32) -> (i32, i32) {
    %c0_i32 = arith.constant 0 : i32
    %c0_i32_0 = arith.constant 0 : i32
    return %c0_i32, %arg0 : i32, i32
  }
  func.func @transform_1(%arg0: i32) -> (i32, i32) {
    %c0_i32 = arith.constant 0 : i32
    %c0_i32_0 = arith.constant 0 : i32
    return %c0_i32, %arg0 : i32, i32
  }
  func.func @transform_2(%arg0: i32) -> (i32, i32) {
    %c0_i32 = arith.constant 0 : i32
    %c0_i32_0 = arith.constant 0 : i32
    %c0_i32_1 = arith.constant 0 : i32
    return %c0_i32, %c0_i32_0 : i32, i32
  }
  func.func @transform_3(%arg0: i32) -> (i32, i32) {
    %c0_i32 = arith.constant 0 : i32
    %c0_i32_0 = arith.constant 0 : i32
    %c0_i32_1 = arith.constant 0 : i32
    return %c0_i32, %c0_i32_0 : i32, i32
  }
  func.func @transform_4(%arg0: i32) -> (i32, i32) {
    %c0_i32 = arith.constant 0 : i32
    %c0_i32_0 = arith.constant 0 : i32
    %c0_i32_1 = arith.constant 0 : i32
    return %c0_i32, %c0_i32_0 : i32, i32
  }
  func.func @transform_5(%arg0: i32) -> (i32, i32) {
    %c0_i32 = arith.constant 0 : i32
    %c0_i32_0 = arith.constant 0 : i32
    %c0_i32_1 = arith.constant 0 : i32
    return %c0_i32, %c0_i32_0 : i32, i32
  }
  func.func @transform_6(%arg0: i32) -> (i32, i32) {
    %c0_i32 = arith.constant 0 : i32
    %c0_i32_0 = arith.constant 0 : i32
    %c0_i32_1 = arith.constant 0 : i32
    return %c0_i32, %c0_i32_0 : i32, i32
  }
  func.func @transform_7(%arg0: i32) -> (i32, i32) {
    %c0_i32 = arith.constant 0 : i32
    %c0_i32_0 = arith.constant 0 : i32
    return %c0_i32, %arg0 : i32, i32
  }
}

</mosaic_0001>

<bundles_post_ra>
// kernel: lig_edge_embed_forward.1
= control target key start
LH: loop header
LB: loop body
LE: loop exit
PB: predicated region body
PF: predicated region fallthrough
CT: control target
= control target key end

     0   :  { %12 = vsyncpa [#allocation4], 0  ;;  %s1064_s0 = inlined_call_operand.vmem [shape: f32[1,256], index: 0, kind: input, shape index: {}]   ;;  %s1065_s1 = inlined_call_operand.vmem [shape: f32[32,256], index: 1, kind: input, shape index: {}]   ;;  %s1066_s2 = inlined_call_operand.vmem [shape: f32[32,1], index: 2, kind: input, shape index: {}]   ;;  %s1067_s3 = inlined_call_operand.vmem [shape: bf16[32,32], index: 3, kind: input, shape index: {}]   ;;  %s1068_s4 = inlined_call_operand.vmem [shape: f32[32,1], index: 4, kind: input, shape index: {}]   ;;  %s1069_s5 = inlined_call_operand.vmem [shape: bf16[32,32], index: 5, kind: input, shape index: {}]   ;;  %s1070_s6 = inlined_call_operand.vmem [shape: f32[32,1], index: 6, kind: input, shape index: {}]   ;;  %s1071_s7 = inlined_call_operand.hbm [shape: f32[32,256], index: 7, kind: output, shape index: {}]  }
   0x1   :  { %14 = vsyncpa [#allocation4 + $0x1], 0  ;;  %s896_s24 = smov 0   ;;  %s898_s25 = smov 0  }
   0x2   :  { %s900_s26 = smov 0   ;;  %s902_s27 = smov 0  }
   0x3 LB: > { %s917_s28 = sadd.s32 4294967295, %s849_s27   ;;  %s687_s29 = sadd.s32 4294967294, %s849_s27   ;;  %s849_s27 = sphi %s902_s27, %s1077_s27   ;;  %s845_s26 = sphi %s900_s26, %s1076_s26   ;;  %s841_s25 = sphi %s898_s25, %s1075_s25   ;;  %s837_s24 = sphi %s896_s24, %s1074_s24  }
   0x4   : > { %s921_s30 = sadd.s32 1, %s849_s27   ;;  %s53_s8 = sadd.s32 1, %s845_s26 }
   0x5   : > { %s50_s9 = ssub.s32 %s849_s27, %s921_s30  ;;  %p60_p0 = scmp.ne.s32.totalorder %s845_s26, %s841_s25 }
   0x6   : > { %p51_p1 = scmp.eq.s32.totalorder %s50_s9, 0  ;;  %p61_p2 = scmp.eq.s32.totalorder %s849_s27, 0 }
   0x7   : > { %p195_p3 = scmp.eq.s32.totalorder %s917_s28, 1  ;;  %p200_p4 = scmp.ne.s32.totalorder %s841_s25, %s837_s24 }
   0x8   : > { %s933_s10 = scalar_select %p51_p1, %s845_s26, %s53_s8  }
   0x9   : > { %p62_p5 = por %p61_p2, %p60_p0  ;;  %p935_p6 = por %p195_p3, %p60_p0 }
   0xa   : > { %p201_p7 = scmp.eq.s32.totalorder %s687_s29, 1  ;;  %p689_p9 = scmp.ge.s32.totalorder %s849_s27, 2 }
   0xc   : > { %p939_p8 = por %p201_p7, %p200_p4  ;;  %232 = sbr.rel (%p689_p9) target bundleno = 23 (0x17), region = 36 }
  0x11   : > { %241 = sbr.rel (!%p62_p5) target bundleno = 23 (0x17), region = 44  ;;  %s243_s13 = sand.u32 (%p62_p5), 1, %s845_s26  }
  0x12   : > { %s691_s14 = sshll.u32 (%p62_p5), %s849_s27, 3  ;;  %s690_s15 = sshll.u32 (%p62_p5), %s243_s13, 5 }
  0x13   : > { %s247_s18 = scalar_lea.vmem (%p62_p5), %s1065_s1, %s691_s14  ;;  %s245_s19 = scalar_lea.vmem (%p62_p5), [#allocation2], %s690_s15 }
  0x14   : > { %v282_v0 = vld [vmem:[%s247_s18] sm:$0xff] (%p62_p5)  ;;  %v284_v1 = vld [vmem:[%s247_s18 + $0x10] sm:$0xff] (%p62_p5) }
  0x15   : > { %v286_v2 = vld [vmem:[%s247_s18 + $0x20] sm:$0xff] (%p62_p5)  ;;  %283 = vst [vmem:[%s245_s19] sm:$0xff] (%p62_p5), %v282_v0  ;;  %285 = vst [vmem:[%s245_s19 + $0x8] sm:$0xff] (%p62_p5), %v284_v1  ;;  %v288_v3 = vld [vmem:[%s247_s18 + $0x30] sm:$0xff] (%p62_p5) }
  0x16   : > { %287 = vst [vmem:[%s245_s19 + $0x10] sm:$0xff] %v286_v2  ;;  %289 = vst [vmem:[%s245_s19 + $0x18] sm:$0xff] %v288_v3 }
  0x17 PF: > { %p692_p10 = scmp.ge.s32.totalorder %s849_s27, 1  ;;  %p294_p11 = scmp.lt.s32.totalorder %s849_s27, 3 }
  0x19   : > { %p295_p12 = pnand %p692_p10, %p294_p11 }
  0x1a   : > { %p335_p13 = scmp.lt.s32.totalorder (!%p295_p12), %s917_s28, 1  ;;  %s301_s14 = sand.u32 (!%p295_p12), 1, %s841_s25  }
  0x1b   : > { %298 = sbr.rel (%p295_p12) target bundleno = 623 (0x26f), region = 82  ;;  %s693_s15 = sshll.u32 (!%p295_p12), %s301_s14, 5 }
  0x1c   : > { %s303_s16 = scalar_lea.vmem (!%p295_p12), [#allocation2], %s693_s15  ;;  %s334_s17 = scalar_lea.vmem (!%p295_p12), [#allocation3], %s693_s15 }
  0x1d   : > { %s705_s19 = sshll.u32 (!%p295_p12), %s917_s28, 7  ;;  %s852_s29 = smov (!%p295_p12), [#allocation3]  }
  0x1e   : > { %s1019_s22 = scalar_lea.hbm (!%p295_p12), %s1071_s7, %s705_s19  ;;  %s793_s8 = sshll.u32 (!%p295_p12), %s852_s29, 4  ;;  %s794_s8 = int_to_ptr.vmem [resolvable:$false] %s793_s8 }
  0x1f   : > { %s795_s9 = scalar_lea.vmem (!%p295_p12), %s794_s8, 1024 }
  0x20   : > { %v342_v4 = vld [vmem:[%s1066_s2 + $0x10] sm:$0xff]  ;;  %v340_v5 = vld [vmem:[%s1066_s2] sm:$0xff]  ;;  %v851_v6 = vmov 0   ;;  %v343_v7 = vld [vmem:[%s1066_s2 + $0x18] sm:$0xff]  ;;  %vm430_vm0 = vcmask 261120   ;;  %s336_s18 = scalar_select %p335_p13, %s917_s28, 1 }
  0x21   : > { %776 = vset.pattern.permute.xlu1 %v851_v6  ;;  %775 = vset.pattern.permute.xlu0 %v851_v6  ;;  %v341_v8 = vld [vmem:[%s1066_s2 + $0x8] sm:$0xff]  ;;  %v398_v9 = vld [vmem:[%s1068_s4 + $0x10] sm:$0xff]  ;;  %v399_v10 = vld [vmem:[%s1068_s4 + $0x18] sm:$0xff]  ;;  %s1023_s28 = scalar_lea.sflag [#allocation4], %s301_s14 }
  0x22   : > { %362 = vperm.xlu0 %775, %v342_v4   ;;  %352 = vperm.xlu1 %776, %v340_v5   ;;  %v396_v11 = vld [vmem:[%s1068_s4] sm:$0xff]  ;;  %v397_v12 = vld [vmem:[%s1068_s4 + $0x8] sm:$0xff]  ;;  %v498_v15 = vld [vmem:[%s1070_s6 + $0x10] sm:$0xff]  ;;  %s337_s21 = scalar_lea.vmem %s1064_s0, %s336_s18  ;;  %s610_s18 = sshll.u32 %s334_s17, 4  ;;  %s1014_s18 = int_to_ptr.vmem [resolvable:$true] %s610_s18 }
  0x23   : > { %v496_v13 = vld [vmem:[%s1070_s6] sm:$0xff]  ;;  %v497_v14 = vld [vmem:[%s1070_s6 + $0x8] sm:$0xff]  ;;  %v499_v16 = vld [vmem:[%s1070_s6 + $0x18] sm:$0xff]  ;;  %s789_s23 = scalar_lea.vmem %s1014_s18, 512  ;;  %p796_p3 = scmp.lt.s32.totalorder %s1014_s18, %s794_s8 }
  0x24   : > { %v777_v17 = vld [vmem:[%s1067_s3] sm:$0xff]   ;;  %v778_v45 = vld [vmem:[%s1067_s3 + $0x8] sm:$0xff]   ;;  %v587_v6 = vld [vmem:[%s303_s16 + $0x10] sm:$0xff]  ;;  %p790_p0 = scmp.ne.s32.totalorder %s1014_s18, %s789_s23  ;;  %p797_p4 = scmp.lt.s32.totalorder %s795_s9, %s789_s23 }
  0x25   : > { %720 = vmatprep.mubr.msk.bf16.mxu0 %vm430_vm0, %v777_v17  ;;  %v695_v18 = vld [vmem:[%s337_s21] ss:$0 sm:$0xff]  ;;  %v780_v1 = vld [vmem:[%s1069_s5 + $0x8] sm:$0xff]  }
  0x26   : > { %367 = vperm.xlu0 %775, %v343_v7   ;;  %357 = vperm.xlu1 %776, %v341_v8   ;;  %v779_v46 = vld [vmem:[%s1069_s5] sm:$0xff]   ;;  %p791_p1 = pnand %p790_p0, %p935_p6  ;;  %p798_p5 = por %p797_p4, %p796_p3 }
  0x27   : > { %728 = vmatprep.mubr.msk.bf16.mxu1 %vm430_vm0, %v779_v46 }
  0x28   : > { %p792_p2 = pneg %p791_p1 }
  0x2a   : > { %412 = vperm.xlu0 %775, %v398_v9   ;;  %417 = vperm.xlu1 %776, %v399_v10   ;;  %v585_v9 = vld [vmem:[%s303_s16] sm:$0xff]  ;;  %p799_p7 = pnand %p798_p5, %p792_p2 }
  0x2e   : > { %402 = vperm.xlu0 %775, %v396_v11   ;;  %407 = vperm.xlu1 %776, %v397_v12  }
  0x32   : > { %502 = vperm.xlu0 %775, %v496_v13   ;;  %507 = vperm.xlu1 %776, %v497_v14   ;;  %v588_v14 = vld [vmem:[%s303_s16 + $0x18] sm:$0xff] }
  0x36   : > { %512 = vperm.xlu0 %775, %v498_v15   ;;  %517 = vperm.xlu1 %776, %v499_v16  }
  0x9d   : > { %v363_v19 = vpop.permute.xlu0 %362  ;;  %v353_v20 = vpop.permute.xlu1 %352 }
  0x9e   : > { %v372_v21 = vsub.f32 %v695_v18, %v363_v19  ;;  %v370_v22 = vsub.f32 %v695_v18, %v353_v20 }
  0xa0   : > { %v376_v23 = vmul.f32 -2.1355557, %v372_v21  ;;  %v374_v24 = vmul.f32 -2.1355557, %v370_v22 }
  0xa1   : > { %v368_v25 = vpop.permute.xlu0 %367  ;;  %v358_v26 = vpop.permute.xlu1 %357 }
  0xa2   : > { %v380_v27 = vmul.f32 %v376_v23, %v372_v21  ;;  %v373_v28 = vsub.f32 %v695_v18, %v368_v25  ;;  %v371_v29 = vsub.f32 %v695_v18, %v358_v26  ;;  %v378_v30 = vmul.f32 %v374_v24, %v370_v22  ;;  %v586_v18 = vld [vmem:[%s303_s16 + $0x8] sm:$0xff] }
  0xa4   : > { %v377_v31 = vmul.f32 -2.1355557, %v373_v28  ;;  %v386_v32 = vmul.f32 1.442695, %v380_v27  ;;  %v375_v33 = vmul.f32 -2.1355557, %v371_v29 }
  0xa5   : > { %v382_v36 = vmul.f32 1.442695, %v378_v30  ;;  %v413_v47 = vpop.permute.xlu0 %412  ;;  %v418_v48 = vpop.permute.xlu1 %417 }
  0xa6   : > { %v381_v34 = vmul.f32 %v377_v31, %v373_v28  ;;  %v379_v35 = vmul.f32 %v375_v33, %v371_v29  ;;  %781 = vpow2.f32 %v386_v32 }
  0xa8   : > { %v388_v37 = vmul.f32 1.442695, %v381_v34  ;;  %v384_v38 = vmul.f32 1.442695, %v379_v35 }
  0xa9   : > { %v403_v52 = vpop.permute.xlu0 %402  ;;  %v408_v56 = vpop.permute.xlu1 %407 }
  0xaa   : > { %783 = vpow2.f32 %v388_v37 }
  0xab   : > { %785 = vpow2.f32 %v384_v38 }
  0xac   : > { %787 = vpow2.f32 %v382_v36 }
  0xad   : > { %v503_v2 = vpop.permute.xlu0 %502  ;;  %v508_v3 = vpop.permute.xlu1 %507 }
  0xb1   : > { %v513_v4 = vpop.permute.xlu0 %512  ;;  %v518_v12 = vpop.permute.xlu1 %517 }
  0xb3   : > { %v782_v39 = vpop.eup %781 }
  0xb7   : > { %v784_v40 = vpop.eup %783 }
  0xb8   : > { %v786_v41 = vpop.eup %785  ;;  %v391_v42 = vpack.c.bf16 %v784_v40, %v782_v39 }
  0xb9   : > { %v788_v43 = vpop.eup %787 }
  0xba   : > { %716 = vmatprep.subr.bf16.mxu0 %v391_v42  ;;  %v390_v44 = vpack.c.bf16 %v786_v41, %v788_v43 }
  0xbb   : > { %717 = vmatpush3.bf16.msra.mxu0 %v391_v42 }
  0xbc   : > { %718 = vmatprep.subr.bf16.mxu0 %v390_v44 }
  0xbf   : > { %719 = vmatpush3.bf16.msra.mxu0 %v390_v44 }
  0xc2   : > { %721 = vmatmul.mubr.msk.bf16.vlgmr.msra.gmra.mxu0 %vm430_vm0, %v778_v45 }
 0x182   : > { %v722_v49 = vpop.f32.mrf.mxu0 }
 0x183   : > { %v480_v51 = vadd.f32 %v722_v49, %v413_v47 }
 0x184   : > { %v471_v50 = vpop.f32.mrf.mxu0 }
 0x185   : > { %v472_v54 = vadd.f32 %v471_v50, %v403_v52  ;;  %v488_v58 = vmax.f32 %v480_v51, 0.0 }
 0x186   : > { %v723_v53 = vpop.f32.mrf.mxu0 }
 0x187   : > { %v483_v55 = vadd.f32 %v723_v53, %v418_v48  ;;  %v486_v61 = vmax.f32 %v472_v54, 0.0 }
 0x188   : > { %v474_v57 = vpop.f32.mrf.mxu0 }
 0x189   : > { %v489_v59 = vmax.f32 %v483_v55, 0.0  ;;  %v475_v60 = vadd.f32 %v474_v57, %v408_v56 }
 0x18b   : > { %v487_v62 = vmax.f32 %v475_v60, 0.0  ;;  %v491_v63 = vpack.c.bf16 %v489_v59, %v488_v58 }
 0x18d   : > { %v490_v0 = vpack.c.bf16 %v487_v62, %v486_v61  ;;  %724 = vmatprep.subr.bf16.mxu1 %v491_v63 }
 0x18e   : > { %725 = vmatpush3.bf16.msra.mxu1 %v491_v63 }
 0x18f   : > { %726 = vmatprep.subr.bf16.mxu1 %v490_v0 }
 0x192   : > { %727 = vmatpush3.bf16.msra.mxu1 %v490_v0 }
 0x195   : > { %729 = vmatmul.mubr.msk.bf16.vlgmr.msra.gmra.mxu1 %vm430_vm0, %v780_v1 }
 0x255   : > { %v730_v5 = vpop.f32.mrf.mxu1 }
 0x256   : > { %v579_v7 = vadd.f32 %v730_v5, %v513_v4 }
 0x257   : > { %v570_v8 = vpop.f32.mrf.mxu1 }
 0x258   : > { %v591_v10 = vadd.f32 %v587_v6, %v579_v7  ;;  %v571_v11 = vadd.f32 %v570_v8, %v503_v2 }
 0x259   : > { %v731_v13 = vpop.f32.mrf.mxu1 }
 0x25a   : > { %595 = vst [vmem:[%s334_s17 + $0x10] sm:$0xff] %v591_v10  ;;  %v589_v15 = vadd.f32 %v585_v9, %v571_v11  ;;  %v582_v16 = vadd.f32 %v731_v13, %v518_v12 }
 0x25b   : > { %v573_v17 = vpop.f32.mrf.mxu1 }
 0x25c   : > { %593 = vst [vmem:[%s334_s17] sm:$0xff] %v589_v15  ;;  %v592_v19 = vadd.f32 %v588_v14, %v582_v16  ;;  %v574_v20 = vadd.f32 %v573_v17, %v508_v3 }
 0x25e   : > { %596 = vst [vmem:[%s334_s17 + $0x18] sm:$0xff] %v592_v19  ;;  %v590_v21 = vadd.f32 %v586_v18, %v574_v20 }
 0x260   : > { %594 = vst [vmem:[%s334_s17 + $0x8] sm:$0xff] %v590_v21 }
 0x261   : > { %802 = shalt.err (!%p799_p7)
}
 0x262   : > { %s803_s13 = scalar_lea.hbm %s1019_s22, 512  ;;  %s807_s16 = scalar_lea.hbm %s1071_s7, 1024 }
 0x263   : > { %p804_p10 = scmp.ne.s32.totalorder %s1019_s22, %s803_s13  ;;  %p808_p13 = scmp.lt.s32.totalorder %s1019_s22, %s1071_s7 }
 0x264   : > { %p809_p0 = scmp.lt.s32.totalorder %s807_s16, %s803_s13 }
 0x265   : > { %p805_p11 = pnand %p804_p10, %p935_p6 }
 0x266   : > { %p810_p1 = por %p809_p0, %p808_p13 }
 0x267   : > { %p806_p12 = pneg %p805_p11 }
 0x269   : > { %p811_p2 = pnand %p810_p1, %p806_p12 }
 0x26b   : > { %814 = shalt.err (!%p811_p2)
}
 0x26c   : > { %s853_s20 = smov 128   ;;  %s854_s21 = smov 256  }
 0x26d   : > { %s855_s23 = smov 8  }
 0x26e   : > { %732 = dma.vmem_to_hbm [thread:$0]  (%p935_p6), %s1014_s18, 512, %s1019_s22, %s1023_s28, %s853_s20, %s854_s21, %s855_s23  }
 0x26f PF: > { %s625_s29 = sand.u32 1, %s837_s24   ;;  %p735_p3 = pnand %p689_p9, %p939_p8 }
 0x270   : > { %s626_s8 = scalar_lea.sflag [#allocation4], %s625_s29 }
 0x271   : > { %p736_p4 = pneg %p735_p3 }
 0x273   : > { %832 = dma.done.wait (%p736_p4), %s626_s8, 512  }
 0x274   : > { %834 = vsyncadd (%p736_p4), %s626_s8, 4294966784  ;;  %p17_p5 = scmp.ge.s32.totalorder %s921_s30, 4   ;;  %s1074_s24 = smov %s841_s25 }
 0x275   : > { %s1075_s25 = smov %s845_s26  ;;  %s1076_s26 = smov %s933_s10 }
 0x276   : > { %s1077_s27 = smov %s921_s30  ;;  %19 = sbr.rel (!%p17_p5) target bundleno = 3 (0x3), region = 129 }
 0x27b   :  { %631 = vsyncpa [#allocation4], 1 }
 0x27c   :  { %633 = vsyncpa [#allocation4 + $0x1], 1 }

</bundles_post_ra>
